<compile_context>
chip_gen: v6e
topology: v6e:2x2x1
jax: 0.10.0
libtpu: 0.0.40
codegen_flags: <defaults>
</compile_context>

<pallas_src>
import functools

import jax
import jax.numpy as jnp
from jax import lax
from jax.experimental import pallas as pl
from jax.experimental.pallas import tpu as pltpu

LANE = 128
SUB = 8
EPS_IOU = 1e-6        # matches the usual yolov3 iou_boxes implementation
LOG_CLAMP = -100.0    # only used by the pure-JAX reference (mirrors nn.BCELoss)

LAMBDA_NOOBJ = 10.0
LAMBDA_OBJ = 1.0
LAMBDA_BOX = 5.0
LAMBDA_CLASS = 1.0


def _round_up(x, m):
    return ((x + m - 1) // m) * m


def _tensorcores_per_chip():
    # Only v7x has 2 TensorCores per chip; v5e/v6e are single-core.
    try:
        kind = jax.devices()[0].device_kind.lower()
    except Exception:
        return 1
    return 2 if ("v7" in kind or "7x" in kind) else 1


def _physical_vmem_bytes():
    try:
        info = pltpu.get_tpu_info()
        for name in ("vmem_capacity_bytes", "vmem_bytes", "vmem_size_bytes"):
            v = getattr(info, name, None)
            if v:
                return int(v)
    except Exception:
        pass
    return 64 * 2 ** 20   # conservative (v7x) default


def yolo_loss_kernel(pred_ref, tgt_ref, anc_ref, meta_ref, out_ref, acc_ref, *,
                     num_classes, tiles_per_core, cells_per_anchor, tr):
    """Masked-loss accumulation over one (C, TR, 128) slab of cells.

    pred_ref: (C, TR, 128)   raw model output, channel-major dense slabs
    tgt_ref:  (6, TR, 128)   (obj, x, y, w, h, class); padded cells have obj=-1
    anc_ref:  (8,)    SMEM   [w0, h0, w1, h1, w2, h2, 0, 0]
    meta_ref: (2, nt) SMEM   row 0 = (tile_base // S^2) % 3, row 1 = tile_base % S^2
    out_ref:  (8, 128)       per-core partial sums (broadcast across lanes)
    acc_ref:  (8, TR, 128)   accumulator planes:
        0 noobj_bce, 1 noobj_cnt, 2 obj_bce, 3 obj_cnt, 4 box_sq, 5 class_ce
    """
    g = pl.program_id(0)
    j = pl.program_id(1)
    t_lin = g * tiles_per_core + j

    @pl.when(j == 0)
    def _():
        acc_ref[...] = jnp.zeros_like(acc_ref)

    pred = pred_ref[...]                                   # (C, TR, 128)
    tgt = tgt_ref[...]                                     # (6, TR, 128)

    # --- per-cell anchor (w, h): anchor index = (cell // S^2) % 3 ------------
    # The coarse part of the division is prefetched from SMEM; the in-tile
    # remainder (< tile + S^2 << 2^21) uses an exact float trick.
    q0m3 = meta_ref[0, t_lin].astype(jnp.float32)          # scalar
    r0 = meta_ref[1, t_lin]                                # scalar int32
    off = (lax.broadcasted_iota(jnp.int32, (tr, LANE), 0) * LANE +
           lax.broadcasted_iota(jnp.int32, (tr, LANE), 1))
    t_off = (off + r0).astype(jnp.float32)
    q1 = jnp.floor((t_off + 0.5) * (1.0 / cells_per_anchor))
    q1m3 = q1 - 3.0 * jnp.floor((q1 + 0.5) * (1.0 / 3.0))
    a_idx = q1m3 + q0m3
    a_idx = a_idx - 3.0 * (a_idx > 2.5).astype(jnp.float32)
    is0 = a_idx < 0.5
    is1 = a_idx < 1.5
    anc_w = jnp.where(is0, anc_ref[0], jnp.where(is1, anc_ref[2], anc_ref[4]))
    anc_h = jnp.where(is0, anc_ref[1], jnp.where(is1, anc_ref[3], anc_ref[5]))

    # --- masks (padded cells have obj = -1 -> match neither) ------------------
    tobj = tgt[0]
    obj_f = (tobj == 1.0).astype(jnp.float32)
    noobj_f = (tobj == 0.0).astype(jnp.float32)

    # --- objectness BCE in logit space ----------------------------------------
    # log(sigmoid(z)) = z - softplus(z); log(1 - sigmoid(z)) = -softplus(z)
    z = pred[0]
    sp = jnp.log(1.0 + jnp.exp(-jnp.abs(z))) + jnp.maximum(z, 0.0)
    noobj_row = noobj_f * sp                               # BCE(sigmoid(z), 0)

    # --- decode boxes ----------------------------------------------------------
    p_x = jax.nn.sigmoid(pred[1])
    p_y = jax.nn.sigmoid(pred[2])
    p_w = jnp.exp(pred[3]) * anc_w
    p_h = jnp.exp(pred[4]) * anc_h
    tx, ty, tw, th = tgt[1], tgt[2], tgt[3], tgt[4]

    # --- IoU(pred_box, target_box), midpoint format ----------------------------
    iw = jnp.maximum(jnp.minimum(p_x + 0.5 * p_w, tx + 0.5 * tw) -
                     jnp.maximum(p_x - 0.5 * p_w, tx - 0.5 * tw), 0.0)
    ih = jnp.maximum(jnp.minimum(p_y + 0.5 * p_h, ty + 0.5 * th) -
                     jnp.maximum(p_y - 0.5 * p_h, ty - 0.5 * th), 0.0)
    inter = iw * ih
    union = jnp.abs(p_w * p_h) + jnp.abs(tw * th) - inter + EPS_IOU
    r = pl.reciprocal(union, approx=True)
    r = r * (2.0 - union * r)                              # Newton step, ~f32 exact
    ious = inter * r

    # obj loss: BCE(sigmoid(z), iou) = softplus(z) - iou * z
    obj_row = obj_f * (sp - ious * z)

    # box loss: sum of squared errors over (x, y, w, h)
    box_row = obj_f * ((p_x - tx) ** 2 + (p_y - ty) ** 2 +
                       (p_w - tw) ** 2 + (p_h - th) ** 2)

    # --- class CE over sigmoided class logits (plane-wise, no K-sized temps) ---
    cls_idx = tgt[5].astype(jnp.int32)
    sum_exp = jnp.zeros((tr, LANE), jnp.float32)
    picked = jnp.zeros((tr, LANE), jnp.float32)
    for kk in range(num_classes):
        pk = jax.nn.sigmoid(pred[5 + kk])
        sum_exp = sum_exp + jnp.exp(pk)
        picked = picked + jnp.where(cls_idx == kk, pk, 0.0)
    # sigmoid outputs are in (0, 1) -> logsumexp needs no max-shift
    ce_row = obj_f * (jnp.log(sum_exp) - picked)

    # --- accumulate: plane-wise adds (planes 6..7 stay zero, never touched) ----
    acc_ref[0] += noobj_row
    acc_ref[1] += noobj_f
    acc_ref[2] += obj_row
    acc_ref[3] += obj_f
    acc_ref[4] += box_row
    acc_ref[5] += ce_row

    # --- finalize: per-core totals (lane/sublane reduce happens once) ----------
    @pl.when(j == pl.num_programs(1) - 1)
    def _():
        sums = jnp.sum(jnp.sum(acc_ref[...], axis=1), axis=1, keepdims=True)
        out_ref[...] = jnp.broadcast_to(sums, (8, LANE))


@jax.jit
def yolo_loss(prediction, target, anchors):
    N, A, S, _, C = prediction.shape
    assert A == 3
    K = C - 5
    SS = S * S
    M = N * A * SS

    phys_vmem = _physical_vmem_bytes()
    ncores_hw = _tensorcores_per_chip()

    # lane- & sublane-dense blocks; 128 MiB-VMEM chips (v5e/v6e) take bigger
    # blocks than v7x (64 MiB) to amortise the ~0.35us per-grid-step overhead.
    tile_cap = 32768 if phys_vmem >= (96 << 20) else 8192
    budget = int(phys_vmem * 0.55)

    def _vmem_estimate(t):
        # double-buffered pred/tgt blocks + accumulator + live row temporaries
        return 4 * t * (2 * C + 2 * 6 + 8 + 32)

    tile = min(tile_cap, _round_up(M, SUB * LANE))
    while tile > SUB * LANE and _vmem_estimate(tile) > budget:
        tile = max(SUB * LANE, _round_up(tile // 2, SUB * LANE))
    tr = tile // LANE

    n_tiles = pl.cdiv(M, tile)
    ncores = ncores_hw if n_tiles >= 2 else 1
    n_tiles = _round_up(n_tiles, ncores)
    tiles_per_core = n_tiles // ncores
    m_pad = n_tiles * tile

    # --- host-side relayout to channel-major dense slabs ----------------------
    # TODO(synk): this is the one remaining extra HBM round trip over
    # `prediction`; emit channel-major [C, M] straight from the model head (or
    # fuse this relayout into the producer) to remove it entirely.
    pred_cm = prediction.reshape(M, C).T.astype(jnp.float32)          # (C, M)
    tgt_cm = target.reshape(M, 6).T.astype(jnp.float32)               # (6, M)
    pad = m_pad - M
    if pad:
        pred_cm = jnp.pad(pred_cm, ((0, 0), (0, pad)))
        # sentinel obj = -1 so padded cells match neither obj nor noobj mask
        tgt_cm = jnp.pad(tgt_cm, ((0, 0), (0, pad)), constant_values=-1.0)
    pred_h = pred_cm.reshape(C, m_pad // LANE, LANE)                   # free
    tgt_h = tgt_cm.reshape(6, m_pad // LANE, LANE)                     # free

    # anchors + exact per-tile anchor-index decomposition (scalars in SMEM)
    anc_s = jnp.zeros((8,), jnp.float32).at[:6].set(
        anchors.reshape(6).astype(jnp.float32))
    base = jnp.arange(n_tiles, dtype=jnp.int32) * tile
    meta = jnp.stack([(base // SS) % 3, base % SS]).astype(jnp.int32)  # (2, nt)

    kernel = functools.partial(
        yolo_loss_kernel, num_classes=K, tiles_per_core=tiles_per_core,
        cells_per_anchor=SS, tr=tr)

    vmem_limit = int(max(32 << 20,
                         min(phys_vmem * 3 // 4,
                             _vmem_estimate(tile) + (16 << 20))))

    if ncores > 1:
        dims = (pltpu.CORE_PARALLEL, pltpu.ARBITRARY)   # real split across v7x TCs
    else:
        dims = ("arbitrary", "arbitrary")

    partial_sums = pl.pallas_call(
        kernel,
        out_shape=jax.ShapeDtypeStruct((ncores * 8, LANE), jnp.float32),
        grid_spec=pltpu.PrefetchScalarGridSpec(
            num_scalar_prefetch=0,
            grid=(ncores, tiles_per_core),
            in_specs=[
                pl.BlockSpec((C, tr, LANE),
                             lambda g, j: (0, g * tiles_per_core + j, 0)),
                pl.BlockSpec((6, tr, LANE),
                             lambda g, j: (0, g * tiles_per_core + j, 0)),
                pl.BlockSpec(memory_space=pltpu.MemorySpace.SMEM),   # anchors
                pl.BlockSpec(memory_space=pltpu.MemorySpace.SMEM),   # tile meta
            ],
            out_specs=pl.BlockSpec((8, LANE), lambda g, j: (g, 0)),
            scratch_shapes=[pltpu.VMEM((8, tr, LANE), jnp.float32)],
        ),
        compiler_params=pltpu.CompilerParams(
            dimension_semantics=dims, vmem_limit_bytes=vmem_limit),
    )(pred_h, tgt_h, anc_s, meta)

    # tiny final reduction + lambda-weighted combination in plain JAX.
    # NOTE: divides by obj / noobj counts exactly like PyTorch's masked means
    # (NaN if a mask is empty, matching nn.*Loss over an empty selection).
    s = jnp.sum(partial_sums.reshape(ncores, 8, LANE)[:, :, 0], axis=0)  # (8,)
    noobj_cnt, obj_cnt = s[1], s[3]
    noobj_loss = s[0] / noobj_cnt
    obj_loss = s[2] / obj_cnt
    box_loss = s[4] / (4.0 * obj_cnt)
    class_loss = s[5] / obj_cnt
    return (LAMBDA_NOOBJ * noobj_loss + LAMBDA_OBJ * obj_loss +
            LAMBDA_BOX * box_loss + LAMBDA_CLASS * class_loss)


def yolo_loss_ref(prediction, target, anchors):
    """Pure-JAX reference mirroring the PyTorch forward (masked-mean form)."""
    obj = target[..., 0] == 1.0
    noobj = target[..., 0] == 0.0
    anc = anchors.reshape(1, 3, 1, 1, 2)
    p_obj = jax.nn.sigmoid(prediction[..., 0])
    p_xy = jax.nn.sigmoid(prediction[..., 1:3])
    p_wh = jnp.exp(prediction[..., 3:5]) * anc
    p_cls = jax.nn.sigmoid(prediction[..., 5:])

    def safelog(x):
        return jnp.maximum(jnp.log(x), LOG_CLAMP)

    noobj_cnt = jnp.sum(noobj)
    noobj_loss = jnp.sum(jnp.where(noobj, -safelog(1.0 - p_obj), 0.0)) / noobj_cnt

    px, py = p_xy[..., 0], p_xy[..., 1]
    pw, ph = p_wh[..., 0], p_wh[..., 1]
    tx, ty = target[..., 1], target[..., 2]
    tw, th = target[..., 3], target[..., 4]
    iw = jnp.maximum(jnp.minimum(px + pw / 2, tx + tw / 2) -
                     jnp.maximum(px - pw / 2, tx - tw / 2), 0.0)
    ih = jnp.maximum(jnp.minimum(py + ph / 2, ty + th / 2) -
                     jnp.maximum(py - ph / 2, ty - th / 2), 0.0)
    inter = iw * ih
    ious = inter / (jnp.abs(pw * ph) + jnp.abs(tw * th) - inter + EPS_IOU)

    obj_cnt = jnp.sum(obj)
    obj_bce = -(ious * safelog(p_obj) + (1.0 - ious) * safelog(1.0 - p_obj))
    object_loss = jnp.sum(jnp.where(obj, obj_bce, 0.0)) / obj_cnt

    p_box = jnp.concatenate([p_xy, p_wh], axis=-1)
    sq = (p_box - target[..., 1:5]) ** 2
    box_loss = jnp.sum(jnp.where(obj[..., None], sq, 0.0)) / (4.0 * obj_cnt)

    cls_idx = target[..., 5].astype(jnp.int32)
    lse = jax.nn.logsumexp(p_cls, axis=-1)
    picked = jnp.take_along_axis(p_cls, cls_idx[..., None], axis=-1)[..., 0]
    ce = lse - picked
    class_loss = jnp.sum(jnp.where(obj, ce, 0.0)) / obj_cnt

    return (LAMBDA_NOOBJ * noobj_loss + LAMBDA_OBJ * object_loss +
            LAMBDA_BOX * box_loss + LAMBDA_CLASS * class_loss)


if __name__ == "__main__":
    N, A, S, K = 2, 3, 8, 3          # M = 2*3*8*8 = 384 cells, C = 8
    C = 5 + K

    key = jax.random.PRNGKey(0)
    k1, k2, k3, k4, k5 = jax.random.split(key, 5)
    prediction = jax.random.normal(k1, (N, A, S, S, C), jnp.float32)
    obj_flag = (jax.random.uniform(k2, (N, A, S, S)) < 0.3).astype(jnp.float32)
    xy = jax.random.uniform(k3, (N, A, S, S, 2), minval=0.05, maxval=0.95)
    wh = jax.random.uniform(k4, (N, A, S, S, 2), minval=0.2, maxval=2.0)
    cls = jax.random.randint(k5, (N, A, S, S), 0, K).astype(jnp.float32)
    target = jnp.concatenate(
        [obj_flag[..., None], xy, wh, cls[..., None]], axis=-1).astype(jnp.float32)
    anchors = jnp.array([[1.0, 1.0], [2.0, 1.5], [0.5, 0.8]], jnp.float32)

    loss = jax.block_until_ready(yolo_loss(prediction, target, anchors))
    ref = jax.block_until_ready(yolo_loss_ref(prediction, target, anchors))

    assert jnp.isfinite(loss), f"non-finite loss: {loss}"
    assert jnp.allclose(loss, ref, rtol=1e-3, atol=1e-3), (loss, ref)
    print("KERNEL_OK")
</pallas_src>

<mosaic_0001>
module attributes {stable_mosaic.version = 11 : i64} {
  func.func @yolo_loss_kernel(%arg0: i32, %arg1: i32, %arg2: memref<8x8x128xf32, #tpu.memory_space<vmem>>, %arg3: memref<6x8x128xf32, #tpu.memory_space<vmem>>, %arg4: memref<8xf32, #tpu.memory_space<smem>>, %arg5: memref<2x1xi32, #tpu.memory_space<smem>>, %arg6: memref<8x128xf32, #tpu.memory_space<vmem>>, %arg7: memref<8x8x128xf32, #tpu.memory_space<vmem>>) attributes {dimension_semantics = [#tpu.dimension_semantics<arbitrary>, #tpu.dimension_semantics<arbitrary>], iteration_bounds = array<i64: 1, 1>, scalar_prefetch = 0 : i64, scratch_operands = 1 : i64, tpu.core_type = #tpu.core_type<tc>, window_params = [{transform_indices = @transform_0, window_bounds = array<i64: 8, 8, 128>}, {transform_indices = @transform_1, window_bounds = array<i64: 6, 8, 128>}, {transform_indices = @transform_2, window_bounds = array<i64: 8>}, {transform_indices = @transform_3, window_bounds = array<i64: 2, 1>}, {transform_indices = @transform_4, window_bounds = array<i64: 8, 128>}]} {
    %c1_i32 = arith.constant 1 : i32
    %0 = arith.muli %arg0, %c1_i32 : i32
    %1 = arith.addi %0, %arg1 : i32
    %c0_i32 = arith.constant 0 : i32
    %2 = arith.cmpi eq, %arg1, %c0_i32 : i32
    %3 = arith.extui %2 : i1 to i32
    %c0_i32_0 = arith.constant 0 : i32
    %4 = arith.cmpi ne, %3, %c0_i32_0 : i32
    scf.if %4 {
      %cst_84 = arith.constant 0.000000e+00 : f32
      %268 = vector.broadcast %cst_84 : f32 to vector<8x8x128xf32>
      %c0_85 = arith.constant 0 : index
      %c0_86 = arith.constant 0 : index
      %c0_87 = arith.constant 0 : index
      %269 = vector.load %arg7[%c0_85, %c0_86, %c0_87] : memref<8x8x128xf32, #tpu.memory_space<vmem>>, vector<8x8x128xf32>
      tpu.vector_store %arg7[%c0_85, %c0_86, %c0_87], %268 {strides = array<i32>} : memref<8x8x128xf32, #tpu.memory_space<vmem>>, vector<8x8x128xf32>,
    } else {
    }
    %c0 = arith.constant 0 : index
    %c0_1 = arith.constant 0 : index
    %c0_2 = arith.constant 0 : index
    %5 = vector.load %arg2[%c0, %c0_1, %c0_2] : memref<8x8x128xf32, #tpu.memory_space<vmem>>, vector<8x8x128xf32>
    %c0_3 = arith.constant 0 : index
    %c0_4 = arith.constant 0 : index
    %c0_5 = arith.constant 0 : index
    %6 = vector.load %arg3[%c0_3, %c0_4, %c0_5] : memref<6x8x128xf32, #tpu.memory_space<vmem>>, vector<6x8x128xf32>
    %c0_6 = arith.constant 0 : index
    %7 = arith.index_cast %1 : i32 to index
    %8 = memref.load %arg5[%c0_6, %7] : memref<2x1xi32, #tpu.memory_space<smem>>
    %9 = arith.sitofp %8 : i32 to f32
    %c1 = arith.constant 1 : index
    %10 = arith.index_cast %1 : i32 to index
    %11 = memref.load %arg5[%c1, %10] : memref<2x1xi32, #tpu.memory_space<smem>>
    %12 = tpu.iota {dimensions = array<i32: 0>} : vector<8x128xi32>
    %c128_i32 = arith.constant 128 : i32
    %13 = vector.broadcast %c128_i32 : i32 to vector<8x128xi32>
    %14 = arith.muli %12, %13 : vector<8x128xi32>
    %15 = tpu.iota {dimensions = array<i32: 1>} : vector<8x128xi32>
    %16 = arith.addi %14, %15 : vector<8x128xi32>
    %17 = vector.broadcast %11 : i32 to vector<8x128xi32>
    %18 = arith.addi %16, %17 : vector<8x128xi32>
    %19 = arith.sitofp %18 : vector<8x128xi32> to vector<8x128xf32>
    %cst = arith.constant 5.000000e-01 : f32
    %20 = vector.broadcast %cst : f32 to vector<8x128xf32>
    %21 = arith.addf %19, %20 : vector<8x128xf32>
    %cst_7 = arith.constant 1.562500e-02 : f32
    %22 = vector.broadcast %cst_7 : f32 to vector<8x128xf32>
    %23 = arith.mulf %21, %22 : vector<8x128xf32>
    %24 = math.floor %23 : vector<8x128xf32>
    %cst_8 = arith.constant 5.000000e-01 : f32
    %25 = vector.broadcast %cst_8 : f32 to vector<8x128xf32>
    %26 = arith.addf %24, %25 : vector<8x128xf32>
    %cst_9 = arith.constant 0.333333343 : f32
    %27 = vector.broadcast %cst_9 : f32 to vector<8x128xf32>
    %28 = arith.mulf %26, %27 : vector<8x128xf32>
    %29 = math.floor %28 : vector<8x128xf32>
    %cst_10 = arith.constant 3.000000e+00 : f32
    %30 = vector.broadcast %cst_10 : f32 to vector<8x128xf32>
    %31 = arith.mulf %30, %29 : vector<8x128xf32>
    %32 = arith.subf %24, %31 : vector<8x128xf32>
    %33 = vector.broadcast %9 : f32 to vector<8x128xf32>
    %34 = arith.addf %32, %33 : vector<8x128xf32>
    %cst_11 = arith.constant 2.500000e+00 : f32
    %35 = vector.broadcast %cst_11 : f32 to vector<8x128xf32>
    %36 = arith.cmpf ogt, %34, %35 : vector<8x128xf32>
    %37 = arith.extui %36 : vector<8x128xi1> to vector<8x128xi32>
    %38 = arith.sitofp %37 : vector<8x128xi32> to vector<8x128xf32>
    %cst_12 = arith.constant 3.000000e+00 : f32
    %39 = vector.broadcast %cst_12 : f32 to vector<8x128xf32>
    %40 = arith.mulf %39, %38 : vector<8x128xf32>
    %41 = arith.subf %34, %40 : vector<8x128xf32>
    %cst_13 = arith.constant 5.000000e-01 : f32
    %42 = vector.broadcast %cst_13 : f32 to vector<8x128xf32>
    %43 = arith.cmpf olt, %41, %42 : vector<8x128xf32>
    %cst_14 = arith.constant 1.500000e+00 : f32
    %44 = vector.broadcast %cst_14 : f32 to vector<8x128xf32>
    %45 = arith.cmpf olt, %41, %44 : vector<8x128xf32>
    %c0_15 = arith.constant 0 : index
    %46 = memref.load %arg4[%c0_15] : memref<8xf32, #tpu.memory_space<smem>>
    %c2 = arith.constant 2 : index
    %47 = memref.load %arg4[%c2] : memref<8xf32, #tpu.memory_space<smem>>
    %c4 = arith.constant 4 : index
    %48 = memref.load %arg4[%c4] : memref<8xf32, #tpu.memory_space<smem>>
    %49 = vector.broadcast %47 : f32 to vector<8x128xf32>
    %50 = vector.broadcast %48 : f32 to vector<8x128xf32>
    %51 = arith.select %45, %49, %50 : vector<8x128xi1>, vector<8x128xf32>
    %52 = vector.broadcast %46 : f32 to vector<8x128xf32>
    %53 = arith.select %43, %52, %51 : vector<8x128xi1>, vector<8x128xf32>
    %c1_16 = arith.constant 1 : index
    %54 = memref.load %arg4[%c1_16] : memref<8xf32, #tpu.memory_space<smem>>
    %c3 = arith.constant 3 : index
    %55 = memref.load %arg4[%c3] : memref<8xf32, #tpu.memory_space<smem>>
    %c5 = arith.constant 5 : index
    %56 = memref.load %arg4[%c5] : memref<8xf32, #tpu.memory_space<smem>>
    %57 = vector.broadcast %55 : f32 to vector<8x128xf32>
    %58 = vector.broadcast %56 : f32 to vector<8x128xf32>
    %59 = arith.select %45, %57, %58 : vector<8x128xi1>, vector<8x128xf32>
    %60 = vector.broadcast %54 : f32 to vector<8x128xf32>
    %61 = arith.select %43, %60, %59 : vector<8x128xi1>, vector<8x128xf32>
    %62 = vector.extract_strided_slice %6 {offsets = [0, 0, 0], sizes = [1, 8, 128], strides = [1, 1, 1]} : vector<6x8x128xf32> to vector<1x8x128xf32>
    %63 = vector.shape_cast %62 : vector<1x8x128xf32> to vector<8x128xf32>
    %cst_17 = arith.constant 1.000000e+00 : f32
    %64 = vector.broadcast %cst_17 : f32 to vector<8x128xf32>
    %65 = arith.cmpf oeq, %63, %64 : vector<8x128xf32>
    %66 = arith.extui %65 : vector<8x128xi1> to vector<8x128xi32>
    %67 = arith.sitofp %66 : vector<8x128xi32> to vector<8x128xf32>
    %cst_18 = arith.constant 0.000000e+00 : f32
    %68 = vector.broadcast %cst_18 : f32 to vector<8x128xf32>
    %69 = arith.cmpf oeq, %63, %68 : vector<8x128xf32>
    %70 = arith.extui %69 : vector<8x128xi1> to vector<8x128xi32>
    %71 = arith.sitofp %70 : vector<8x128xi32> to vector<8x128xf32>
    %72 = vector.extract_strided_slice %5 {offsets = [0, 0, 0], sizes = [1, 8, 128], strides = [1, 1, 1]} : vector<8x8x128xf32> to vector<1x8x128xf32>
    %73 = vector.shape_cast %72 : vector<1x8x128xf32> to vector<8x128xf32>
    %74 = math.absf %73 : vector<8x128xf32>
    %cst_19 = arith.constant 0.000000e+00 : f32
    %75 = vector.broadcast %cst_19 : f32 to vector<8x128xf32>
    %76 = arith.subf %75, %74 : vector<8x128xf32>
    %77 = math.exp %76 : vector<8x128xf32>
    %cst_20 = arith.constant 1.000000e+00 : f32
    %78 = vector.broadcast %cst_20 : f32 to vector<8x128xf32>
    %79 = arith.addf %78, %77 : vector<8x128xf32>
    %80 = math.log %79 : vector<8x128xf32>
    %cst_21 = arith.constant 0.000000e+00 : f32
    %81 = vector.broadcast %cst_21 : f32 to vector<8x128xf32>
    %82 = arith.maximumf %73, %81 : vector<8x128xf32>
    %83 = arith.addf %80, %82 : vector<8x128xf32>
    %84 = arith.mulf %71, %83 : vector<8x128xf32>
    %85 = vector.extract_strided_slice %5 {offsets = [1, 0, 0], sizes = [1, 8, 128], strides = [1, 1, 1]} : vector<8x8x128xf32> to vector<1x8x128xf32>
    %86 = vector.shape_cast %85 : vector<1x8x128xf32> to vector<8x128xf32>
    %87 = arith.negf %86 : vector<8x128xf32>
    %88 = math.exp %87 : vector<8x128xf32>
    %cst_22 = arith.constant 1.000000e+00 : f32
    %89 = vector.broadcast %cst_22 : f32 to vector<8x128xf32>
    %90 = arith.addf %89, %88 : vector<8x128xf32>
    %91 = arith.divf %89, %90 : vector<8x128xf32>
    %92 = vector.extract_strided_slice %5 {offsets = [2, 0, 0], sizes = [1, 8, 128], strides = [1, 1, 1]} : vector<8x8x128xf32> to vector<1x8x128xf32>
    %93 = vector.shape_cast %92 : vector<1x8x128xf32> to vector<8x128xf32>
    %94 = arith.negf %93 : vector<8x128xf32>
    %95 = math.exp %94 : vector<8x128xf32>
    %cst_23 = arith.constant 1.000000e+00 : f32
    %96 = vector.broadcast %cst_23 : f32 to vector<8x128xf32>
    %97 = arith.addf %96, %95 : vector<8x128xf32>
    %98 = arith.divf %96, %97 : vector<8x128xf32>
    %99 = vector.extract_strided_slice %5 {offsets = [3, 0, 0], sizes = [1, 8, 128], strides = [1, 1, 1]} : vector<8x8x128xf32> to vector<1x8x128xf32>
    %100 = vector.shape_cast %99 : vector<1x8x128xf32> to vector<8x128xf32>
    %101 = math.exp %100 : vector<8x128xf32>
    %102 = arith.mulf %101, %53 : vector<8x128xf32>
    %103 = vector.extract_strided_slice %5 {offsets = [4, 0, 0], sizes = [1, 8, 128], strides = [1, 1, 1]} : vector<8x8x128xf32> to vector<1x8x128xf32>
    %104 = vector.shape_cast %103 : vector<1x8x128xf32> to vector<8x128xf32>
    %105 = math.exp %104 : vector<8x128xf32>
    %106 = arith.mulf %105, %61 : vector<8x128xf32>
    %107 = vector.extract_strided_slice %6 {offsets = [1, 0, 0], sizes = [1, 8, 128], strides = [1, 1, 1]} : vector<6x8x128xf32> to vector<1x8x128xf32>
    %108 = vector.shape_cast %107 : vector<1x8x128xf32> to vector<8x128xf32>
    %109 = vector.extract_strided_slice %6 {offsets = [2, 0, 0], sizes = [1, 8, 128], strides = [1, 1, 1]} : vector<6x8x128xf32> to vector<1x8x128xf32>
    %110 = vector.shape_cast %109 : vector<1x8x128xf32> to vector<8x128xf32>
    %111 = vector.extract_strided_slice %6 {offsets = [3, 0, 0], sizes = [1, 8, 128], strides = [1, 1, 1]} : vector<6x8x128xf32> to vector<1x8x128xf32>
    %112 = vector.shape_cast %111 : vector<1x8x128xf32> to vector<8x128xf32>
    %113 = vector.extract_strided_slice %6 {offsets = [4, 0, 0], sizes = [1, 8, 128], strides = [1, 1, 1]} : vector<6x8x128xf32> to vector<1x8x128xf32>
    %114 = vector.shape_cast %113 : vector<1x8x128xf32> to vector<8x128xf32>
    %cst_24 = arith.constant 5.000000e-01 : f32
    %115 = vector.broadcast %cst_24 : f32 to vector<8x128xf32>
    %116 = arith.mulf %115, %102 : vector<8x128xf32>
    %117 = arith.addf %91, %116 : vector<8x128xf32>
    %cst_25 = arith.constant 5.000000e-01 : f32
    %118 = vector.broadcast %cst_25 : f32 to vector<8x128xf32>
    %119 = arith.mulf %118, %112 : vector<8x128xf32>
    %120 = arith.addf %108, %119 : vector<8x128xf32>
    %121 = arith.minimumf %117, %120 : vector<8x128xf32>
    %cst_26 = arith.constant 5.000000e-01 : f32
    %122 = vector.broadcast %cst_26 : f32 to vector<8x128xf32>
    %123 = arith.mulf %122, %102 : vector<8x128xf32>
    %124 = arith.subf %91, %123 : vector<8x128xf32>
    %cst_27 = arith.constant 5.000000e-01 : f32
    %125 = vector.broadcast %cst_27 : f32 to vector<8x128xf32>
    %126 = arith.mulf %125, %112 : vector<8x128xf32>
    %127 = arith.subf %108, %126 : vector<8x128xf32>
    %128 = arith.maximumf %124, %127 : vector<8x128xf32>
    %129 = arith.subf %121, %128 : vector<8x128xf32>
    %cst_28 = arith.constant 0.000000e+00 : f32
    %130 = vector.broadcast %cst_28 : f32 to vector<8x128xf32>
    %131 = arith.maximumf %129, %130 : vector<8x128xf32>
    %cst_29 = arith.constant 5.000000e-01 : f32
    %132 = vector.broadcast %cst_29 : f32 to vector<8x128xf32>
    %133 = arith.mulf %132, %106 : vector<8x128xf32>
    %134 = arith.addf %98, %133 : vector<8x128xf32>
    %cst_30 = arith.constant 5.000000e-01 : f32
    %135 = vector.broadcast %cst_30 : f32 to vector<8x128xf32>
    %136 = arith.mulf %135, %114 : vector<8x128xf32>
    %137 = arith.addf %110, %136 : vector<8x128xf32>
    %138 = arith.minimumf %134, %137 : vector<8x128xf32>
    %cst_31 = arith.constant 5.000000e-01 : f32
    %139 = vector.broadcast %cst_31 : f32 to vector<8x128xf32>
    %140 = arith.mulf %139, %106 : vector<8x128xf32>
    %141 = arith.subf %98, %140 : vector<8x128xf32>
    %cst_32 = arith.constant 5.000000e-01 : f32
    %142 = vector.broadcast %cst_32 : f32 to vector<8x128xf32>
    %143 = arith.mulf %142, %114 : vector<8x128xf32>
    %144 = arith.subf %110, %143 : vector<8x128xf32>
    %145 = arith.maximumf %141, %144 : vector<8x128xf32>
    %146 = arith.subf %138, %145 : vector<8x128xf32>
    %cst_33 = arith.constant 0.000000e+00 : f32
    %147 = vector.broadcast %cst_33 : f32 to vector<8x128xf32>
    %148 = arith.maximumf %146, %147 : vector<8x128xf32>
    %149 = arith.mulf %131, %148 : vector<8x128xf32>
    %150 = arith.mulf %102, %106 : vector<8x128xf32>
    %151 = math.absf %150 : vector<8x128xf32>
    %152 = arith.mulf %112, %114 : vector<8x128xf32>
    %153 = math.absf %152 : vector<8x128xf32>
    %154 = arith.addf %151, %153 : vector<8x128xf32>
    %155 = arith.subf %154, %149 : vector<8x128xf32>
    %cst_34 = arith.constant 9.99999997E-7 : f32
    %156 = vector.broadcast %cst_34 : f32 to vector<8x128xf32>
    %157 = arith.addf %155, %156 : vector<8x128xf32>
    %158 = tpu.reciprocal %157 {approx = true} : vector<8x128xf32> -> vector<8x128xf32>
    %159 = arith.mulf %157, %158 : vector<8x128xf32>
    %cst_35 = arith.constant 2.000000e+00 : f32
    %160 = vector.broadcast %cst_35 : f32 to vector<8x128xf32>
    %161 = arith.subf %160, %159 : vector<8x128xf32>
    %162 = arith.mulf %158, %161 : vector<8x128xf32>
    %163 = arith.mulf %149, %162 : vector<8x128xf32>
    %164 = arith.mulf %163, %73 : vector<8x128xf32>
    %165 = arith.subf %83, %164 : vector<8x128xf32>
    %166 = arith.mulf %67, %165 : vector<8x128xf32>
    %167 = arith.subf %91, %108 : vector<8x128xf32>
    %168 = arith.mulf %167, %167 : vector<8x128xf32>
    %169 = arith.subf %98, %110 : vector<8x128xf32>
    %170 = arith.mulf %169, %169 : vector<8x128xf32>
    %171 = arith.addf %168, %170 : vector<8x128xf32>
    %172 = arith.subf %102, %112 : vector<8x128xf32>
    %173 = arith.mulf %172, %172 : vector<8x128xf32>
    %174 = arith.addf %171, %173 : vector<8x128xf32>
    %175 = arith.subf %106, %114 : vector<8x128xf32>
    %176 = arith.mulf %175, %175 : vector<8x128xf32>
    %177 = arith.addf %174, %176 : vector<8x128xf32>
    %178 = arith.mulf %67, %177 : vector<8x128xf32>
    %179 = vector.extract_strided_slice %6 {offsets = [5, 0, 0], sizes = [1, 8, 128], strides = [1, 1, 1]} : vector<6x8x128xf32> to vector<1x8x128xf32>
    %180 = vector.shape_cast %179 : vector<1x8x128xf32> to vector<8x128xf32>
    %181 = arith.fptosi %180 : vector<8x128xf32> to vector<8x128xi32>
    %cst_36 = arith.constant 0.000000e+00 : f32
    %182 = vector.broadcast %cst_36 : f32 to vector<8x128xf32>
    %cst_37 = arith.constant 0.000000e+00 : f32
    %183 = vector.broadcast %cst_37 : f32 to vector<8x128xf32>
    %184 = vector.extract_strided_slice %5 {offsets = [5, 0, 0], sizes = [1, 8, 128], strides = [1, 1, 1]} : vector<8x8x128xf32> to vector<1x8x128xf32>
    %185 = vector.shape_cast %184 : vector<1x8x128xf32> to vector<8x128xf32>
    %186 = arith.negf %185 : vector<8x128xf32>
    %187 = math.exp %186 : vector<8x128xf32>
    %cst_38 = arith.constant 1.000000e+00 : f32
    %188 = vector.broadcast %cst_38 : f32 to vector<8x128xf32>
    %189 = arith.addf %188, %187 : vector<8x128xf32>
    %190 = arith.divf %188, %189 : vector<8x128xf32>
    %191 = math.exp %190 : vector<8x128xf32>
    %192 = arith.addf %182, %191 : vector<8x128xf32>
    %c0_i32_39 = arith.constant 0 : i32
    %193 = vector.broadcast %c0_i32_39 : i32 to vector<8x128xi32>
    %194 = arith.cmpi eq, %181, %193 : vector<8x128xi32>
    %cst_40 = arith.constant 0.000000e+00 : f32
    %195 = vector.broadcast %cst_40 : f32 to vector<8x128xf32>
    %196 = arith.select %194, %190, %195 : vector<8x128xi1>, vector<8x128xf32>
    %197 = arith.addf %183, %196 : vector<8x128xf32>
    %198 = vector.extract_strided_slice %5 {offsets = [6, 0, 0], sizes = [1, 8, 128], strides = [1, 1, 1]} : vector<8x8x128xf32> to vector<1x8x128xf32>
    %199 = vector.shape_cast %198 : vector<1x8x128xf32> to vector<8x128xf32>
    %200 = arith.negf %199 : vector<8x128xf32>
    %201 = math.exp %200 : vector<8x128xf32>
    %cst_41 = arith.constant 1.000000e+00 : f32
    %202 = vector.broadcast %cst_41 : f32 to vector<8x128xf32>
    %203 = arith.addf %202, %201 : vector<8x128xf32>
    %204 = arith.divf %202, %203 : vector<8x128xf32>
    %205 = math.exp %204 : vector<8x128xf32>
    %206 = arith.addf %192, %205 : vector<8x128xf32>
    %c1_i32_42 = arith.constant 1 : i32
    %207 = vector.broadcast %c1_i32_42 : i32 to vector<8x128xi32>
    %208 = arith.cmpi eq, %181, %207 : vector<8x128xi32>
    %cst_43 = arith.constant 0.000000e+00 : f32
    %209 = vector.broadcast %cst_43 : f32 to vector<8x128xf32>
    %210 = arith.select %208, %204, %209 : vector<8x128xi1>, vector<8x128xf32>
    %211 = arith.addf %197, %210 : vector<8x128xf32>
    %212 = vector.extract_strided_slice %5 {offsets = [7, 0, 0], sizes = [1, 8, 128], strides = [1, 1, 1]} : vector<8x8x128xf32> to vector<1x8x128xf32>
    %213 = vector.shape_cast %212 : vector<1x8x128xf32> to vector<8x128xf32>
    %214 = arith.negf %213 : vector<8x128xf32>
    %215 = math.exp %214 : vector<8x128xf32>
    %cst_44 = arith.constant 1.000000e+00 : f32
    %216 = vector.broadcast %cst_44 : f32 to vector<8x128xf32>
    %217 = arith.addf %216, %215 : vector<8x128xf32>
    %218 = arith.divf %216, %217 : vector<8x128xf32>
    %219 = math.exp %218 : vector<8x128xf32>
    %220 = arith.addf %206, %219 : vector<8x128xf32>
    %c2_i32 = arith.constant 2 : i32
    %221 = vector.broadcast %c2_i32 : i32 to vector<8x128xi32>
    %222 = arith.cmpi eq, %181, %221 : vector<8x128xi32>
    %cst_45 = arith.constant 0.000000e+00 : f32
    %223 = vector.broadcast %cst_45 : f32 to vector<8x128xf32>
    %224 = arith.select %222, %218, %223 : vector<8x128xi1>, vector<8x128xf32>
    %225 = arith.addf %211, %224 : vector<8x128xf32>
    %226 = math.log %220 : vector<8x128xf32>
    %227 = arith.subf %226, %225 : vector<8x128xf32>
    %228 = arith.mulf %67, %227 : vector<8x128xf32>
    %c0_46 = arith.constant 0 : index
    %c0_47 = arith.constant 0 : index
    %c0_48 = arith.constant 0 : index
    %229 = vector.load %arg7[%c0_46, %c0_47, %c0_48] : memref<8x8x128xf32, #tpu.memory_space<vmem>>, vector<1x8x128xf32>
    %230 = vector.shape_cast %229 : vector<1x8x128xf32> to vector<8x128xf32>
    %231 = arith.addf %230, %84 : vector<8x128xf32>
    %c0_49 = arith.constant 0 : index
    %c0_50 = arith.constant 0 : index
    %c0_51 = arith.constant 0 : index
    %232 = vector.load %arg7[%c0_49, %c0_50, %c0_51] : memref<8x8x128xf32, #tpu.memory_space<vmem>>, vector<1x8x128xf32>
    %233 = vector.shape_cast %232 : vector<1x8x128xf32> to vector<8x128xf32>
    %234 = vector.shape_cast %231 : vector<8x128xf32> to vector<1x8x128xf32>
    tpu.vector_store %arg7[%c0_49, %c0_50, %c0_51], %234 {strides = array<i32>} : memref<8x8x128xf32, #tpu.memory_space<vmem>>, vector<1x8x128xf32>,
    %c1_52 = arith.constant 1 : index
    %c0_53 = arith.constant 0 : index
    %c0_54 = arith.constant 0 : index
    %235 = vector.load %arg7[%c1_52, %c0_53, %c0_54] : memref<8x8x128xf32, #tpu.memory_space<vmem>>, vector<1x8x128xf32>
    %236 = vector.shape_cast %235 : vector<1x8x128xf32> to vector<8x128xf32>
    %237 = arith.addf %236, %71 : vector<8x128xf32>
    %c1_55 = arith.constant 1 : index
    %c0_56 = arith.constant 0 : index
    %c0_57 = arith.constant 0 : index
    %238 = vector.load %arg7[%c1_55, %c0_56, %c0_57] : memref<8x8x128xf32, #tpu.memory_space<vmem>>, vector<1x8x128xf32>
    %239 = vector.shape_cast %238 : vector<1x8x128xf32> to vector<8x128xf32>
    %240 = vector.shape_cast %237 : vector<8x128xf32> to vector<1x8x128xf32>
    tpu.vector_store %arg7[%c1_55, %c0_56, %c0_57], %240 {strides = array<i32>} : memref<8x8x128xf32, #tpu.memory_space<vmem>>, vector<1x8x128xf32>,
    %c2_58 = arith.constant 2 : index
    %c0_59 = arith.constant 0 : index
    %c0_60 = arith.constant 0 : index
    %241 = vector.load %arg7[%c2_58, %c0_59, %c0_60] : memref<8x8x128xf32, #tpu.memory_space<vmem>>, vector<1x8x128xf32>
    %242 = vector.shape_cast %241 : vector<1x8x128xf32> to vector<8x128xf32>
    %243 = arith.addf %242, %166 : vector<8x128xf32>
    %c2_61 = arith.constant 2 : index
    %c0_62 = arith.constant 0 : index
    %c0_63 = arith.constant 0 : index
    %244 = vector.load %arg7[%c2_61, %c0_62, %c0_63] : memref<8x8x128xf32, #tpu.memory_space<vmem>>, vector<1x8x128xf32>
    %245 = vector.shape_cast %244 : vector<1x8x128xf32> to vector<8x128xf32>
    %246 = vector.shape_cast %243 : vector<8x128xf32> to vector<1x8x128xf32>
    tpu.vector_store %arg7[%c2_61, %c0_62, %c0_63], %246 {strides = array<i32>} : memref<8x8x128xf32, #tpu.memory_space<vmem>>, vector<1x8x128xf32>,
    %c3_64 = arith.constant 3 : index
    %c0_65 = arith.constant 0 : index
    %c0_66 = arith.constant 0 : index
    %247 = vector.load %arg7[%c3_64, %c0_65, %c0_66] : memref<8x8x128xf32, #tpu.memory_space<vmem>>, vector<1x8x128xf32>
    %248 = vector.shape_cast %247 : vector<1x8x128xf32> to vector<8x128xf32>
    %249 = arith.addf %248, %67 : vector<8x128xf32>
    %c3_67 = arith.constant 3 : index
    %c0_68 = arith.constant 0 : index
    %c0_69 = arith.constant 0 : index
    %250 = vector.load %arg7[%c3_67, %c0_68, %c0_69] : memref<8x8x128xf32, #tpu.memory_space<vmem>>, vector<1x8x128xf32>
    %251 = vector.shape_cast %250 : vector<1x8x128xf32> to vector<8x128xf32>
    %252 = vector.shape_cast %249 : vector<8x128xf32> to vector<1x8x128xf32>
    tpu.vector_store %arg7[%c3_67, %c0_68, %c0_69], %252 {strides = array<i32>} : memref<8x8x128xf32, #tpu.memory_space<vmem>>, vector<1x8x128xf32>,
    %c4_70 = arith.constant 4 : index
    %c0_71 = arith.constant 0 : index
    %c0_72 = arith.constant 0 : index
    %253 = vector.load %arg7[%c4_70, %c0_71, %c0_72] : memref<8x8x128xf32, #tpu.memory_space<vmem>>, vector<1x8x128xf32>
    %254 = vector.shape_cast %253 : vector<1x8x128xf32> to vector<8x128xf32>
    %255 = arith.addf %254, %178 : vector<8x128xf32>
    %c4_73 = arith.constant 4 : index
    %c0_74 = arith.constant 0 : index
    %c0_75 = arith.constant 0 : index
    %256 = vector.load %arg7[%c4_73, %c0_74, %c0_75] : memref<8x8x128xf32, #tpu.memory_space<vmem>>, vector<1x8x128xf32>
    %257 = vector.shape_cast %256 : vector<1x8x128xf32> to vector<8x128xf32>
    %258 = vector.shape_cast %255 : vector<8x128xf32> to vector<1x8x128xf32>
    tpu.vector_store %arg7[%c4_73, %c0_74, %c0_75], %258 {strides = array<i32>} : memref<8x8x128xf32, #tpu.memory_space<vmem>>, vector<1x8x128xf32>,
    %c5_76 = arith.constant 5 : index
    %c0_77 = arith.constant 0 : index
    %c0_78 = arith.constant 0 : index
    %259 = vector.load %arg7[%c5_76, %c0_77, %c0_78] : memref<8x8x128xf32, #tpu.memory_space<vmem>>, vector<1x8x128xf32>
    %260 = vector.shape_cast %259 : vector<1x8x128xf32> to vector<8x128xf32>
    %261 = arith.addf %260, %228 : vector<8x128xf32>
    %c5_79 = arith.constant 5 : index
    %c0_80 = arith.constant 0 : index
    %c0_81 = arith.constant 0 : index
    %262 = vector.load %arg7[%c5_79, %c0_80, %c0_81] : memref<8x8x128xf32, #tpu.memory_space<vmem>>, vector<1x8x128xf32>
    %263 = vector.shape_cast %262 : vector<1x8x128xf32> to vector<8x128xf32>
    %264 = vector.shape_cast %261 : vector<8x128xf32> to vector<1x8x128xf32>
    tpu.vector_store %arg7[%c5_79, %c0_80, %c0_81], %264 {strides = array<i32>} : memref<8x8x128xf32, #tpu.memory_space<vmem>>, vector<1x8x128xf32>,
    %c0_i32_82 = arith.constant 0 : i32
    %265 = arith.cmpi eq, %arg1, %c0_i32_82 : i32
    %266 = arith.extui %265 : i1 to i32
    %c0_i32_83 = arith.constant 0 : i32
    %267 = arith.cmpi ne, %266, %c0_i32_83 : i32
    scf.if %267 {
      %c0_84 = arith.constant 0 : index
      %c0_85 = arith.constant 0 : index
      %c0_86 = arith.constant 0 : index
      %268 = vector.load %arg7[%c0_84, %c0_85, %c0_86] : memref<8x8x128xf32, #tpu.memory_space<vmem>>, vector<8x8x128xf32>
      %cst_87 = arith.constant dense<0.000000e+00> : vector<8x128xf32>
      %269 = vector.multi_reduction <add>, %268, %cst_87 [1] : vector<8x8x128xf32> to vector<8x128xf32>
      %cst_88 = arith.constant dense<0.000000e+00> : vector<8xf32>
      %270 = vector.multi_reduction <add>, %269, %cst_88 [1] : vector<8x128xf32> to vector<8xf32>
      %271 = vector.shape_cast %270 : vector<8xf32> to vector<8x1xf32>
      %272 = vector.shape_cast %271 : vector<8x1xf32> to vector<8x1xf32>
      %273 = vector.broadcast %272 : vector<8x1xf32> to vector<8x128xf32>
      %c0_89 = arith.constant 0 : index
      %c0_90 = arith.constant 0 : index
      %274 = vector.load %arg6[%c0_89, %c0_90] : memref<8x128xf32, #tpu.memory_space<vmem>>, vector<8x128xf32>
      tpu.vector_store %arg6[%c0_89, %c0_90], %273 {strides = array<i32>} : memref<8x128xf32, #tpu.memory_space<vmem>>, vector<8x128xf32>,
    } else {
    }
    return
  }
  func.func @transform_0(%arg0: i32, %arg1: i32) -> (i32, i32, i32) {
    %c1_i32 = arith.constant 1 : i32
    %0 = arith.muli %arg0, %c1_i32 : i32
    %1 = arith.addi %0, %arg1 : i32
    %c0_i32 = arith.constant 0 : i32
    %c0_i32_0 = arith.constant 0 : i32
    %c0_i32_1 = arith.constant 0 : i32
    return %c0_i32, %1, %c0_i32_0 : i32, i32, i32
  }
  func.func @transform_1(%arg0: i32, %arg1: i32) -> (i32, i32, i32) {
    %c1_i32 = arith.constant 1 : i32
    %0 = arith.muli %arg0, %c1_i32 : i32
    %1 = arith.addi %0, %arg1 : i32
    %c0_i32 = arith.constant 0 : i32
    %c0_i32_0 = arith.constant 0 : i32
    %c0_i32_1 = arith.constant 0 : i32
    return %c0_i32, %1, %c0_i32_0 : i32, i32, i32
  }
  func.func @transform_2(%arg0: i32, %arg1: i32) -> i32 {
    %c0_i32 = arith.constant 0 : i32
    %c0_i32_0 = arith.constant 0 : i32
    return %c0_i32 : i32
  }
  func.func @transform_3(%arg0: i32, %arg1: i32) -> (i32, i32) {
    %c0_i32 = arith.constant 0 : i32
    %c0_i32_0 = arith.constant 0 : i32
    %c0_i32_1 = arith.constant 0 : i32
    return %c0_i32, %c0_i32_0 : i32, i32
  }
  func.func @transform_4(%arg0: i32, %arg1: i32) -> (i32, i32) {
    %c0_i32 = arith.constant 0 : i32
    %c0_i32_0 = arith.constant 0 : i32
    return %arg0, %c0_i32 : i32, i32
  }
}

</mosaic_0001>

<bundles_post_ra>
// kernel: yolo_loss.1
= control target key start
LH: loop header
LB: loop body
LE: loop exit
PB: predicated region body
PF: predicated region fallthrough
CT: control target
= control target key end

     0   :  { %9 = vsyncpa [#allocation4], 0  ;;  %s612_s0 = inlined_call_operand.vmem [shape: f32[8,8,128], index: 0, kind: input, shape index: {}]   ;;  %s613_s1 = inlined_call_operand.vmem [shape: f32[6,8,128], index: 1, kind: input, shape index: {}]   ;;  %s614_s2 = inlined_call_operand.vmem [shape: f32[8], index: 2, kind: input, shape index: {}]   ;;  %s615_s3 = inlined_call_operand.vmem [shape: s32[2,1], index: 3, kind: input, shape index: {}]   ;;  %s616_s4 = inlined_call_operand.vmem [shape: f32[8,128], index: 4, kind: output, shape index: {}]  }
   0x1   :  { %s33_s17 = sshll.u32 %s614_s2, 4  ;;  %s34_s17 = int_to_ptr.vmem [resolvable:$true] %s33_s17 }
   0x2   :  { %10 = vsyncpa [#allocation6], 0  ;;  %s43_s20 = sshll.u32 %s615_s3, 4  ;;  %s461_s21 = scalar_lea.vmem %s34_s17, 16  ;;  %s44_s20 = int_to_ptr.vmem [resolvable:$true] %s43_s20 }
   0x3   :  { %p462_p0 = scmp.ne.s32.totalorder %s34_s17, %s461_s21  ;;  %p466_p1 = scmp.lt.s32.totalorder %s34_s17, %s34_s17 }
   0x4   :  { %p467_p2 = scmp.lt.s32.totalorder %s461_s21, %s461_s21 }
   0x6   :  { %p468_p3 = por %p467_p2, %p466_p1 }
   0x8   :  { %p469_p4 = pnand %p468_p3, %p462_p0 }
   0xa   :  { %472 = shalt.err (!%p469_p4)
}
   0xb   :  { %s489_s22 = smov [#allocation3]   ;;  %s473_s23 = scalar_lea.vmem %s44_s20, 32 }
   0xc   :  { %36 = dma.vmem_to_smem %s34_s17, 16, %s489_s22, [#allocation4]  }
   0xd   :  { %p474_p5 = scmp.ne.s32.totalorder %s44_s20, %s473_s23  ;;  %p478_p6 = scmp.lt.s32.totalorder %s44_s20, %s44_s20 }
   0xe   :  { %p479_p7 = scmp.lt.s32.totalorder %s473_s23, %s473_s23 }
  0x10   :  { %p480_p8 = por %p479_p7, %p478_p6 }
  0x12   :  { %p481_p9 = pnand %p480_p8, %p474_p5 }
  0x14   :  { %484 = shalt.err (!%p481_p9)
}
  0x15   :  { %s490_s2 = smov [#allocation5]  }
  0x16   :  { %46 = dma.vmem_to_smem %s44_s20, 32, %s490_s2, [#allocation6]  }
  0x17   :  { %485 = dma.done.wait [#allocation4], 16  }
  0x18   :  { %486 = vsyncadd [#allocation4], 4294967280 }
  0x19   :  { %487 = dma.done.wait [#allocation6], 32  }
  0x1a   :  { %488 = vsyncadd [#allocation6], 4294967264 }
  0x1b   :  { %53 = sfence }
  0x1c   :  { %v113_v0 = vlaneseq  ;;  %s404_s3 = sld [smem:[#allocation5 + $0x80]]  ;;  %v90_v3 = vld [vmem:[%s612_s0 + $0x8] sm:$0xff]  ;;  %v91_v4 = vld [vmem:[%s612_s0 + $0x10] sm:$0xff]  ;;  %v532_v8 = vld [vmem:[%s612_s0] sm:$0xff]  ;;  %v491_v45 = vmov 0.0   ;;  %vm368_vm8 = vcmask 1041409  }
  0x1d   :  { %v413_v7 = vmul.f32 -1.442695, %v90_v3  ;;  %v414_v10 = vmul.f32 -1.442695, %v91_v4  ;;  %v94_v12 = vld [vmem:[%s612_s0 + $0x28] sm:$0xff]  ;;  %v95_v13 = vld [vmem:[%s612_s0 + $0x30] sm:$0xff] }
  0x1e   :  { %v114_v1 = vshrl.u32 %v113_v0, 7  ;;  %v117_v2 = vand.u32 127, %v113_v0  ;;  %v161_v15 = vand.u32 2147483647, %v532_v8  ;;  %v96_v16 = vld [vmem:[%s612_s0 + $0x38] sm:$0xff]  ;;  %s544_s10 = sld [smem:[#allocation5]] }
  0x1f   :  { %423 = vpow2.f32 %v413_v7  ;;  %v415_v18 = vmul.f32 -1.442695, %v94_v12  ;;  %v416_v19 = vmul.f32 -1.442695, %v95_v13  ;;  %v92_v20 = vld [vmem:[%s612_s0 + $0x18] sm:$0xff]  ;;  %v93_v24 = vld [vmem:[%s612_s0 + $0x20] sm:$0xff] }
  0x20   :  { %v115_v5 = vmul.u32 128, %v114_v1  ;;  %425 = vpow2.f32 %v414_v10  ;;  %v162_v22 = vsub.f32 0.0, %v161_v15  ;;  %v417_v23 = vmul.f32 -1.442695, %v96_v16  ;;  %s553_s16 = sld [smem:[#allocation3]]  ;;  %v569_v49 = vld [vmem:[%s613_s1 + $0x18] sm:$0xff] }
  0x21   :  { %427 = vpow2.f32 %v415_v18  ;;  %v183_v26 = vmul.f32 1.442695, %v92_v20  ;;  %v186_v29 = vmul.f32 1.442695, %v93_v24  ;;  %s555_s17 = sld [smem:[#allocation3 + $0x2]]  ;;  %v575_v52 = vld [vmem:[%s613_s1 + $0x20] sm:$0xff] }
  0x22   :  { %v118_v6 = vadd.s32 %v117_v2, %v115_v5  ;;  %v119_v9 = vstv %s404_s3  ;;  %429 = vpow2.f32 %v416_v19  ;;  %v163_v28 = vmul.f32 1.442695, %v162_v22  ;;  %s557_s0 = sld [smem:[#allocation3 + $0x4]]  ;;  %v98_v62 = vld [vmem:[%s613_s1 + $0x8] sm:$0xff]  ;;  %v99_v2 = vld [vmem:[%s613_s1 + $0x10] sm:$0xff] }
  0x23   :  { %431 = vpow2.f32 %v417_v23  ;;  %s559_s18 = sld [smem:[#allocation3 + $0x3]]  ;;  %v191_v61 = vmul.f32 0.5, %v569_v49  ;;  %v201_v1 = vmul.f32 0.5, %v575_v52  ;;  %v212_v18 = vmul.f32 %v575_v52, %v569_v49 }
  0x24   :  { %v120_v11 = vadd.s32 %v119_v9, %v118_v6  ;;  %s104_s15 = scvt.s32.f32 %s544_s10  ;;  %433 = vpow2.f32 %v183_v26  ;;  %s561_s19 = sld [smem:[#allocation3 + $0x5]]  ;;  %vm370_vm9 = vcmask 1042434   ;;  %vm372_vm10 = vcmask 1043459  }
  0x25   :  { %435 = vpow2.f32 %v163_v28  ;;  %s563_s20 = sld [smem:[#allocation3 + $0x1]]  ;;  %v195_v13 = vsub.f32 %v98_v62, %v191_v61  ;;  %v202_v15 = vadd.f32 %v201_v1, %v99_v2  ;;  %v205_v16 = vsub.f32 %v99_v2, %v201_v1 }
  0x26   :  { %v121_v14 = vcvt.s32.f32 %v120_v11  ;;  %437 = vpow2.f32 %v186_v29  ;;  %v130_v37 = vstv %s104_s15  ;;  %v145_v58 = vstv %s553_s16 }
  0x27   :  { %v142_v50 = vstv %s555_s17  ;;  %v192_v11 = vadd.f32 %v191_v61, %v98_v62  ;;  %vm374_vm11 = vcmask 1044484   ;;  %vm376_vm12 = vcmask 1045509  }
  0x28   :  { %v122_v17 = vadd.f32 0.5, %v121_v14  ;;  %v143_v54 = vstv %s557_s0  ;;  %vm378_vm13 = vcmask 1046534   ;;  %vm380_vm14 = vcmask 1047559  }
  0x29   :  { %v150_v55 = vstv %s559_s18 }
  0x2a   :  { %v123_v21 = vmul.f32 0.015625, %v122_v17  ;;  %v151_v56 = vstv %s561_s19 }
  0x2b   :  { %v153_v59 = vstv %s563_s20 }
  0x2c   :  { %v124_v25 = vfloor.f32 %v123_v21  ;;  %v424_v31 = vpop.eup %423 }
  0x2d   :  { %v426_v32 = vpop.eup %425  ;;  %v174_v34 = vadd.f32 1.0, %v424_v31  ;;  %v213_v31 = vand.u32 2147483647, %v212_v18 }
  0x2e   :  { %v125_v27 = vadd.f32 0.5, %v124_v25  ;;  %v180_v35 = vadd.f32 1.0, %v426_v32  ;;  %v428_v39 = vpop.eup %427 }
  0x2f   :  { %439 = vrcp.f32 %v174_v34  ;;  %v430_v41 = vpop.eup %429  ;;  %v241_v42 = vadd.f32 1.0, %v428_v39 }
  0x30   :  { %v126_v30 = vmul.f32 0.33333334, %v125_v27  ;;  %441 = vrcp.f32 %v180_v35  ;;  %v432_v43 = vpop.eup %431  ;;  %v253_v44 = vadd.f32 1.0, %v430_v41 }
  0x31   :  { %443 = vrcp.f32 %v241_v42  ;;  %v265_v47 = vadd.f32 1.0, %v432_v43  ;;  %v434_v51 = vpop.eup %433 }
  0x32   :  { %v127_v33 = vfloor.f32 %v126_v30  ;;  %445 = vrcp.f32 %v253_v44  ;;  %v436_v57 = vpop.eup %435 }
  0x33   :  { %447 = vrcp.f32 %v265_v47  ;;  %v438_v60 = vpop.eup %437  ;;  %v165_v6 = vadd.f32 1.0, %v436_v57 }
  0x34   :  { %v128_v36 = vmul.f32 3.0, %v127_v33 }
  0x35   :  { %449 = vlog2.f32 %v165_v6 }
  0x36   :  { %v129_v38 = vsub.f32 %v124_v25, %v128_v36 }
  0x38   :  { %v131_v40 = vadd.f32 %v130_v37, %v129_v38 }
  0x3a   :  { %vm132_vm0 = vcmp.gt.f32.partialorder %v131_v40, 2.5 }
  0x3b   :  { %v405_v46 = vsel %vm132_vm0, 1.0, %v491_v45 }
  0x3c   :  { %v135_v48 = vmul.f32 3.0, %v405_v46  ;;  %v440_v5 = vpop.eup %439 }
  0x3d   :  { %v442_v10 = vpop.eup %441  ;;  %v225_v41 = vsub.f32 %v440_v5, %v98_v62 }
  0x3e   :  { %v136_v53 = vsub.f32 %v131_v40, %v135_v48  ;;  %v444_v22 = vpop.eup %443  ;;  %v227_v42 = vsub.f32 %v442_v10, %v99_v2 }
  0x3f   :  { %v446_v24 = vpop.eup %445  ;;  %v244_v33 = vmul.f32 1.442695, %v444_v22  ;;  %v226_v47 = vmul.f32 %v225_v41, %v225_v41 }
  0x40   :  { %vm137_vm1 = vcmp.lt.f32.partialorder %v136_v53, 0.5  ;;  %vm138_vm2 = vcmp.lt.f32.partialorder %v136_v53, 1.5  ;;  %v592_v28 = vpop.eup %447  ;;  %v256_v34 = vmul.f32 1.442695, %v446_v24  ;;  %v228_v48 = vmul.f32 %v227_v42, %v227_v42  ;;  %v102_v53 = vld [vmem:[%s613_s1 + $0x28] sm:$0xff] }
  0x41   :  { %v144_v63 = vsel %vm138_vm2, %v142_v50, %v143_v54  ;;  %v152_v0 = vsel %vm138_vm2, %v150_v55, %v151_v56  ;;  %v268_v36 = vmul.f32 1.442695, %v592_v28  ;;  %451 = vpow2.f32 %v244_v33 }
  0x42   :  { %v146_v3 = vsel %vm137_vm1, %v145_v58, %v144_v63  ;;  %v154_v4 = vsel %vm137_vm1, %v153_v59, %v152_v0  ;;  %453 = vpow2.f32 %v256_v34  ;;  %v450_v44 = vpop.eup %449  ;;  %v168_v55 = vmax.f32 %v532_v8, 0.0 }
  0x43   :  { %v185_v7 = vmul.f32 %v434_v51, %v146_v3  ;;  %v188_v9 = vmul.f32 %v438_v60, %v154_v4  ;;  %455 = vpow2.f32 %v268_v36  ;;  %v97_v51 = vld [vmem:[%s613_s1] sm:$0xff]  ;;  %v167_v54 = vmul.f32 0.6931472, %v450_v44 }
  0x44   :  { %v229_v56 = vadd.f32 %v228_v48, %v226_v47  ;;  %vm158_vm3 = vcmp.eq.f32.partialorder %v97_v51, 0.0  ;;  %v418_v60 = vtrunc.f32 %v102_v53  ;;  %vm155_vm4 = vcmp.eq.f32.partialorder %v97_v51, 1.0 }
  0x45   :  { %v189_v12 = vmul.f32 0.5, %v185_v7  ;;  %v199_v14 = vmul.f32 0.5, %v188_v9  ;;  %v210_v17 = vmul.f32 %v188_v9, %v185_v7  ;;  %v230_v50 = vsub.f32 %v185_v7, %v569_v49 }
  0x46   :  { %v233_v58 = vsub.f32 %v188_v9, %v575_v52  ;;  %v169_v61 = vadd.f32 %v168_v55, %v167_v54  ;;  %v412_v63 = vsel %vm158_vm3, 1.0, %v491_v45  ;;  %v419_v3 = vcvt.f32.s32 %v418_v60 }
  0x47   :  { %v190_v19 = vadd.f32 %v440_v5, %v189_v12  ;;  %v194_v20 = vsub.f32 %v440_v5, %v189_v12  ;;  %v200_v21 = vadd.f32 %v442_v10, %v199_v14  ;;  %v204_v23 = vsub.f32 %v442_v10, %v199_v14 }
  0x48   :  { %v211_v30 = vand.u32 2147483647, %v210_v17  ;;  %v231_v57 = vmul.f32 %v230_v50, %v230_v50  ;;  %v234_v1 = vmul.f32 %v233_v58, %v233_v58  ;;  %v170_v5 = vmul.f32 %v412_v63, %v169_v61 }
  0x49   :  { %v193_v25 = vmin.f32 %v190_v19, %v192_v11  ;;  %v196_v26 = vmax.f32 %v194_v20, %v195_v13  ;;  %v203_v27 = vmin.f32 %v200_v21, %v202_v15  ;;  %v206_v29 = vmax.f32 %v204_v23, %v205_v16 }
  0x4a   :  { %v214_v39 = vadd.f32 %v213_v31, %v211_v30  ;;  %v232_v0 = vadd.f32 %v231_v57, %v229_v56  ;;  %vm247_vm5 = vcmp.eq.s32.totalorder %v419_v3, 0  ;;  %vm259_vm6 = vcmp.eq.s32.totalorder %v419_v3, 1 }
  0x4b   :  { %v197_v32 = vsub.f32 %v193_v25, %v196_v26  ;;  %v207_v35 = vsub.f32 %v203_v27, %v206_v29  ;;  %v411_v7 = vsel %vm155_vm4, 1.0, %v491_v45  ;;  %v312_v9 = vrot.slane %v170_v5, 4 }
  0x4c   :  { %v235_v6 = vadd.f32 %v234_v1, %v232_v0  ;;  %v318_v10 = vrot.slane %v412_v63, 4  ;;  %v248_v13 = vsel %vm247_vm5, %v444_v22, 0.0  ;;  %v260_v14 = vsel %vm259_vm6, %v446_v24, 0.0 }
  0x4d   :  { %v198_v37 = vmax.f32 %v197_v32, 0.0  ;;  %v208_v38 = vmax.f32 %v207_v35, 0.0  ;;  %vm271_vm7 = vcmp.eq.s32.totalorder %v419_v3, 2  ;;  %v313_v16 = vadd.f32 %v312_v9, %v170_v5 }
  0x4e   :  { %v452_v59 = vpop.eup %451  ;;  %v236_v12 = vmul.f32 %v411_v7, %v235_v6  ;;  %v319_v17 = vadd.f32 %v412_v63, %v318_v10  ;;  %v330_v18 = vrot.slane %v411_v7, 4  ;;  %v261_v20 = vadd.f32 %v260_v14, %v248_v13 }
  0x4f   :  { %v209_v40 = vmul.f32 %v208_v38, %v198_v37  ;;  %v454_v49 = vpop.eup %453  ;;  %v272_v23 = vsel %vm271_vm7, %v592_v28, 0.0  ;;  %v314_v26 = vrot.slane %v313_v16, 2  ;;  %v348_v34 = vrot.slane %v491_v45, 4 }
  0x50   :  { %v456_v62 = vpop.eup %455  ;;  %v258_v2 = vadd.f32 %v454_v49, %v452_v59  ;;  %v336_v21 = vrot.slane %v236_v12, 4  ;;  %v320_v27 = vrot.slane %v319_v17, 2  ;;  %v331_v29 = vadd.f32 %v411_v7, %v330_v18 }
  0x51   :  { %v215_v43 = vsub.f32 %v214_v39, %v209_v40  ;;  %v273_v31 = vadd.f32 %v272_v23, %v261_v20  ;;  %v315_v35 = vadd.f32 %v314_v26, %v313_v16  ;;  %v350_v42 = vrot.slane %v348_v34, 2 }
  0x52   :  { %v270_v4 = vadd.f32 %v456_v62, %v258_v2  ;;  %v337_v32 = vadd.f32 %v336_v21, %v236_v12  ;;  %v321_v36 = vadd.f32 %v320_v27, %v319_v17  ;;  %v332_v37 = vrot.slane %v331_v29, 2 }
  0x53   :  { %v216_v46 = vadd.f32 1e-06, %v215_v43  ;;  %v316_v43 = vrot.slane %v315_v35, 1  ;;  %v351_v53 = vadd.f32 %v350_v42, %v348_v34 }
  0x54   :  { %v338_v41 = vrot.slane %v337_v32, 2  ;;  %v322_v44 = vrot.slane %v321_v36, 1 }
  0x55   :  { %457 = vrcp.f32 %v216_v46  ;;  %v317_v54 = vadd.f32 %v316_v43, %v315_v35  ;;  %v352_v49 = vrot.slane %v351_v53, 1 }
  0x56   :  { %459 = vlog2.f32 %v270_v4  ;;  %v339_v47 = vadd.f32 %v338_v41, %v337_v32  ;;  %v323_v45 = vadd.f32 %v322_v44, %v321_v36 }
  0x57   :  { %v353_v3 = vadd.f32 %v352_v49, %v351_v53 }
  0x58   :  { %v340_v57 = vrot.slane %v339_v47, 1  ;;  %v369_v62 = vsel %vm368_vm8, %v323_v45, %v317_v54 }
  0x5a   :  { %v341_v0 = vadd.f32 %v340_v57, %v339_v47 }
  0x62   :  { %v458_v52 = vpop.eup %457 }
  0x63   :  { %v218_v11 = vmul.f32 %v458_v52, %v216_v46  ;;  %v460_v22 = vpop.eup %459  ;;  %v333_v46 = vadd.f32 %v332_v37, %v331_v29 }
  0x64   :  { %v275_v33 = vmul.f32 0.6931472, %v460_v22 }
  0x65   :  { %v219_v15 = vsub.f32 2.0, %v218_v11  ;;  %v334_v55 = vrot.slane %v333_v46, 1 }
  0x66   :  { %v276_v39 = vsub.f32 %v275_v33, %v273_v31 }
  0x67   :  { %v220_v19 = vmul.f32 %v458_v52, %v219_v15 }
  0x68   :  { %v277_v28 = vmul.f32 %v411_v7, %v276_v39 }
  0x69   :  { %v221_v25 = vmul.f32 %v220_v19, %v209_v40 }
  0x6a   :  { %v342_v48 = vrot.slane %v277_v28, 4 }
  0x6b   :  { %v222_v30 = vmul.f32 %v221_v25, %v532_v8 }
  0x6c   :  { %v343_v51 = vadd.f32 %v342_v48, %v277_v28 }
  0x6d   :  { %v223_v24 = vsub.f32 %v169_v61, %v222_v30  ;;  %v335_v61 = vadd.f32 %v334_v55, %v333_v46 }
  0x6e   :  { %v344_v58 = vrot.slane %v343_v51, 2 }
  0x6f   :  { %v224_v38 = vmul.f32 %v411_v7, %v223_v24 }
  0x70   :  { %v345_v60 = vadd.f32 %v344_v58, %v343_v51 }
  0x71   :  { %v324_v40 = vrot.slane %v224_v38, 4 }
  0x72   :  { %v346_v1 = vrot.slane %v345_v60, 1 }
  0x73   :  { %v325_v8 = vadd.f32 %v324_v40, %v224_v38 }
  0x74   :  { %v347_v2 = vadd.f32 %v346_v1, %v345_v60 }
  0x75   :  { %v326_v50 = vrot.slane %v325_v8, 2 }
  0x77   :  { %v327_v56 = vadd.f32 %v326_v50, %v325_v8 }
  0x79   :  { %v328_v59 = vrot.slane %v327_v56, 1 }
  0x7b   :  { %v329_v63 = vadd.f32 %v328_v59, %v327_v56 }
  0x7d   :  { %v371_v4 = vsel %vm370_vm9, %v329_v63, %v369_v62 }
  0x7e   :  { %v373_v5 = vsel %vm372_vm10, %v335_v61, %v371_v4 }
  0x7f   :  { %v375_v6 = vsel %vm374_vm11, %v341_v0, %v373_v5 }
  0x80   :  { %v377_v52 = vsel %vm376_vm12, %v347_v2, %v375_v6 }
  0x81   :  { %v379_v7 = vsel %vm378_vm13, %v353_v3, %v377_v52 }
  0x82   :  { %v381_v9 = vsel %vm380_vm14, %v353_v3, %v379_v7 }
  0x83   :  { %383 = vadd.xlane.f32.xlu0 %v381_v9 }
 0x10c   :  { %v384_v10 = vpop.xlane.xlu0 %383 }
 0x10d   :  { %385 = vst [vmem:[%s616_s4] sm:$0xff] %v384_v10 }
 0x10e   :  { %390 = vsyncpa [#allocation4], 1 }
 0x10f   :  { %391 = vsyncpa [#allocation6], 1 }

</bundles_post_ra>
